<compile_context>
chip_gen: v5e
topology: v5e:2x2
jax: 0.10.0
libtpu: 0.0.40
codegen_flags: <defaults>
</compile_context>

<pallas_src>
import math
import jax
import jax.numpy as jnp
from jax.experimental import pallas as pl
from jax.experimental.pallas import tpu as pltpu


def _gconv_kernel(x_ref, w_ref, adjc_ref, bias_ref, o_ref):
    """One batch-tile of the fused GConv forward.

    x_ref    : (TB*N, C_in)      node features, batch folded into rows (MXU M dim)
    w_ref    : (G, C_in, C_out)  per-group linear weights (no lane slicing needed)
    adjc_ref : (N, G*N)          concatenated adjacency, adjc[n, g*N + m] = adj[g, n, m]
    bias_ref : (1, TB*C_out)     bias tiled across the packed batch lanes
    o_ref    : (1, N, TB*C_out)  packed output, o[0, n, b*C_out + c] = out[b, n, c]
    """
    n, gn = adjc_ref.shape
    g = gn // n
    c_out = w_ref.shape[2]
    tb = x_ref.shape[0] // n

    x = x_ref[...]                                    # (TB*N, C_in)

    # Linear: one MXU dot per group with the whole batch tile in the M dim.
    # Then pack the batch into lanes and the groups into the contraction rows so the
    # group sum happens inside the second matmul (no zeros-init / VPU accumulation,
    # no 32-wide lane slices of a fused (TB*N, G*C_out) activation).
    z_rows = []
    for gg in range(g):                               # static unroll, G is small
        h_g = jnp.dot(x, w_ref[gg],
                      preferred_element_type=jnp.float32)        # (TB*N, C_out)
        if tb == 1:
            z_rows.append(h_g)                                   # (N, C_out)
        else:
            # batch -> lanes: rows are sublane-aligned (N is a multiple of 8 here)
            z_rows.append(jnp.concatenate(
                [h_g[b * n:(b + 1) * n, :] for b in range(tb)], axis=1))  # (N, TB*C_out)
    z = z_rows[0] if g == 1 else jnp.concatenate(z_rows, axis=0)          # (G*N, TB*C_out)

    # Aggregation + group sum in a single MXU dot with contraction depth G*N and a
    # lane-dense (TB*C_out wide) RHS / output.
    y = jnp.dot(adjc_ref[...], z, preferred_element_type=jnp.float32)     # (N, TB*C_out)

    o_ref[0] = (y + bias_ref[...]).astype(o_ref.dtype)


def gconv_forward(x, weight, adj, bias, *, batch_tile=None):
    """
    Args:
      x:      (B, N, C_in)      float32
      weight: (C_in, G*C_out)   float32  (transpose of the PyTorch Linear weight)
      adj:    (G, N, N)         float32
      bias:   (C_out,)          float32
      batch_tile: batch elements processed per grid step (default: all of B).
    Returns:
      out:    (B, N, C_out)     float32
    """
    B, N, C_in = x.shape
    G = adj.shape[0]
    GCout = weight.shape[1]
    C_out = GCout // G

    TB = B if batch_tile is None else max(1, min(batch_tile, B))
    nt = pl.cdiv(B, TB)
    B_pad = nt * TB

    # ---- wrapper-side layout plumbing (plain XLA ops, outside the kernel) ----
    x_flat = x.reshape(B * N, C_in)
    if B_pad != B:
        x_flat = jnp.pad(x_flat, ((0, (B_pad - B) * N), (0, 0)))
    # per-group weights: w_g[g, i, c] = weight[i, g*C_out + c]
    w_g = weight.reshape(C_in, G, C_out).transpose(1, 0, 2)
    # concatenated adjacency: adj_cat[n, g*N + m] = adj[g, n, m]
    adj_cat = adj.transpose(1, 0, 2).reshape(N, G * N)
    # bias tiled across the packed batch lanes
    bias_packed = jnp.tile(bias.reshape(1, C_out), (1, TB))     # (1, TB*C_out)

    flops = 2 * B * N * C_in * G * C_out + 2 * B * G * N * N * C_out
    bytes_accessed = 4 * (x.size + weight.size + adj.size + bias.size + B * N * C_out)
    cost = pl.CostEstimate(flops=flops, transcendentals=0,
                           bytes_accessed=bytes_accessed)

    out_packed = pl.pallas_call(
        _gconv_kernel,
        out_shape=jax.ShapeDtypeStruct((nt, N, TB * C_out), x.dtype),
        grid_spec=pltpu.PrefetchScalarGridSpec(
            num_scalar_prefetch=0,
            grid=(nt,),
            in_specs=[
                pl.BlockSpec((TB * N, C_in), lambda t: (t, 0)),
                pl.BlockSpec((G, C_in, C_out), lambda t: (0, 0, 0)),
                pl.BlockSpec((N, G * N), lambda t: (0, 0)),
                pl.BlockSpec((1, TB * C_out), lambda t: (0, 0)),
            ],
            out_specs=pl.BlockSpec((1, N, TB * C_out), lambda t: (t, 0, 0)),
        ),
        compiler_params=pltpu.CompilerParams(
            dimension_semantics=("parallel",)),
        cost_estimate=cost,
    )(x_flat, w_g, adj_cat, bias_packed)

    # Unpack lanes: out_packed[t, n, b*C_out + c] -> out[t*TB + b, n, c]
    out = (out_packed.reshape(nt, N, TB, C_out)
           .transpose(0, 2, 1, 3)
           .reshape(B_pad, N, C_out))
    return out[:B]


def gconv_reference(x, weight, adj, bias):
    """Pure-JAX reference matching the PyTorch forward exactly."""
    B, N, C_in = x.shape
    G = adj.shape[0]
    C_out = weight.shape[1] // G
    h = jnp.einsum("bni,io->bno", x, weight)                  # (B, N, G*C_out)
    h = h.reshape(B, N, G, C_out).transpose(0, 2, 1, 3)       # (B, G, N, C_out)
    y = jnp.einsum("gnm,bgmo->bgno", adj, h)                  # adj broadcast over B
    y = y.sum(axis=1)                                         # (B, N, C_out)
    return y + bias


if __name__ == "__main__":
    # Small synthetic shapes consistent with the module.
    B, N, C_in, C_out, G = 2, 16, 32, 32, 2

    key = jax.random.PRNGKey(0)
    k_x, k_w, k_adj, k_b = jax.random.split(key, 4)

    x = jax.random.normal(k_x, (B, N, C_in), dtype=jnp.float32)

    # Deterministic Xavier-uniform init for Linear(in_features, G*C_out) weight.
    # PyTorch weight shape is (G*C_out, C_in); we store its transpose (C_in, G*C_out).
    fan_in, fan_out = C_in, G * C_out
    gain_bound = math.sqrt(6.0 / (fan_in + fan_out))
    weight = jax.random.uniform(
        k_w, (C_in, G * C_out), dtype=jnp.float32,
        minval=-gain_bound, maxval=gain_bound)

    # Bias init: uniform(-1/sqrt(fan_in), 1/sqrt(fan_in)).
    b_bound = 1.0 / math.sqrt(fan_in)
    bias = jax.random.uniform(
        k_b, (C_out,), dtype=jnp.float32, minval=-b_bound, maxval=b_bound)

    # Normalized adjacency: row-softmax of random logits per group.
    adj_logits = jax.random.normal(k_adj, (G, N, N), dtype=jnp.float32)
    adj = jax.nn.softmax(adj_logits, axis=-1)

    out = gconv_forward(x, weight, adj, bias)
    jax.block_until_ready(out)

    ref = gconv_reference(x, weight, adj, bias)
    assert out.shape == (B, N, C_out)
    assert jnp.allclose(out, ref, atol=1e-4, rtol=1e-4), "mismatch vs reference"

    print("KERNEL_OK")
</pallas_src>

<mosaic_0001>
module attributes {stable_mosaic.version = 11 : i64} {
  func.func @_gconv_kernel(%arg0: i32, %arg1: memref<32x32xf32, #tpu.memory_space<vmem>>, %arg2: memref<2x32x32xf32, #tpu.memory_space<vmem>>, %arg3: memref<16x32xf32, #tpu.memory_space<vmem>>, %arg4: memref<1x64xf32, #tpu.memory_space<vmem>>, %arg5: memref<1x16x64xf32, #tpu.memory_space<vmem>>) attributes {dimension_semantics = [#tpu.dimension_semantics<parallel>], iteration_bounds = array<i64: 1>, scalar_prefetch = 0 : i64, scratch_operands = 0 : i64, tpu.core_type = #tpu.core_type<tc>, window_params = [{transform_indices = @transform_0, window_bounds = array<i64: 32, 32>}, {pipeline_mode = #tpu.pipeline_mode<synchronous>, transform_indices = @transform_1, window_bounds = array<i64: 2, 32, 32>}, {pipeline_mode = #tpu.pipeline_mode<synchronous>, transform_indices = @transform_2, window_bounds = array<i64: 16, 32>}, {pipeline_mode = #tpu.pipeline_mode<synchronous>, transform_indices = @transform_3, window_bounds = array<i64: 1, 64>}, {transform_indices = @transform_4, window_bounds = array<i64: 1, 16, 64>}]} {
    %c0 = arith.constant 0 : index
    %c0_0 = arith.constant 0 : index
    %0 = vector.load %arg1[%c0, %c0_0] : memref<32x32xf32, #tpu.memory_space<vmem>>, vector<32x32xf32>
    %c0_1 = arith.constant 0 : index
    %c0_2 = arith.constant 0 : index
    %c0_3 = arith.constant 0 : index
    %1 = vector.load %arg2[%c0_1, %c0_2, %c0_3] : memref<2x32x32xf32, #tpu.memory_space<vmem>>, vector<1x32x32xf32>
    %2 = vector.shape_cast %1 : vector<1x32x32xf32> to vector<32x32xf32>
    %cst = arith.constant dense<0.000000e+00> : vector<32x32xf32>
    %3 = tpu.matmul %0, %2, %cst {dimension_numbers = #tpu.dot_dimension_numbers<[1], [0], [0], [1], [0, 0, 1, 1], [], []>} : vector<32x32xf32>, vector<32x32xf32>, vector<32x32xf32> -> vector<32x32xf32>
    %4 = vector.extract_strided_slice %3 {offsets = [0, 0], sizes = [16, 32], strides = [1, 1]} : vector<32x32xf32> to vector<16x32xf32>
    %5 = vector.extract_strided_slice %3 {offsets = [16, 0], sizes = [16, 32], strides = [1, 1]} : vector<32x32xf32> to vector<16x32xf32>
    %6 = tpu.concatenate %4, %5 in 1 : vector<16x32xf32>, vector<16x32xf32> -> vector<16x64xf32>
    %c1 = arith.constant 1 : index
    %c0_4 = arith.constant 0 : index
    %c0_5 = arith.constant 0 : index
    %7 = vector.load %arg2[%c1, %c0_4, %c0_5] : memref<2x32x32xf32, #tpu.memory_space<vmem>>, vector<1x32x32xf32>
    %8 = vector.shape_cast %7 : vector<1x32x32xf32> to vector<32x32xf32>
    %cst_6 = arith.constant dense<0.000000e+00> : vector<32x32xf32>
    %9 = tpu.matmul %0, %8, %cst_6 {dimension_numbers = #tpu.dot_dimension_numbers<[1], [0], [0], [1], [0, 0, 1, 1], [], []>} : vector<32x32xf32>, vector<32x32xf32>, vector<32x32xf32> -> vector<32x32xf32>
    %10 = vector.extract_strided_slice %9 {offsets = [0, 0], sizes = [16, 32], strides = [1, 1]} : vector<32x32xf32> to vector<16x32xf32>
    %11 = vector.extract_strided_slice %9 {offsets = [16, 0], sizes = [16, 32], strides = [1, 1]} : vector<32x32xf32> to vector<16x32xf32>
    %12 = tpu.concatenate %10, %11 in 1 : vector<16x32xf32>, vector<16x32xf32> -> vector<16x64xf32>
    %13 = tpu.concatenate %6, %12 in 0 : vector<16x64xf32>, vector<16x64xf32> -> vector<32x64xf32>
    %c0_7 = arith.constant 0 : index
    %c0_8 = arith.constant 0 : index
    %14 = vector.load %arg3[%c0_7, %c0_8] : memref<16x32xf32, #tpu.memory_space<vmem>>, vector<16x32xf32>
    %cst_9 = arith.constant dense<0.000000e+00> : vector<16x64xf32>
    %15 = tpu.matmul %14, %13, %cst_9 {dimension_numbers = #tpu.dot_dimension_numbers<[1], [0], [0], [1], [0, 0, 1, 1], [], []>} : vector<16x32xf32>, vector<32x64xf32>, vector<16x64xf32> -> vector<16x64xf32>
    %c0_10 = arith.constant 0 : index
    %c0_11 = arith.constant 0 : index
    %16 = vector.load %arg4[%c0_10, %c0_11] : memref<1x64xf32, #tpu.memory_space<vmem>>, vector<1x64xf32>
    %17 = vector.broadcast %16 : vector<1x64xf32> to vector<16x64xf32>
    %18 = arith.addf %15, %17 : vector<16x64xf32>
    %c0_12 = arith.constant 0 : index
    %c0_13 = arith.constant 0 : index
    %c0_14 = arith.constant 0 : index
    %19 = vector.load %arg5[%c0_12, %c0_13, %c0_14] : memref<1x16x64xf32, #tpu.memory_space<vmem>>, vector<1x16x64xf32>
    %20 = vector.shape_cast %19 : vector<1x16x64xf32> to vector<16x64xf32>
    %21 = vector.shape_cast %18 : vector<16x64xf32> to vector<1x16x64xf32>
    tpu.vector_store %arg5[%c0_12, %c0_13, %c0_14], %21 {strides = array<i32>} : memref<1x16x64xf32, #tpu.memory_space<vmem>>, vector<1x16x64xf32>,
    return
  }
  func.func @transform_0(%arg0: i32) -> (i32, i32) {
    %c0_i32 = arith.constant 0 : i32
    %c0_i32_0 = arith.constant 0 : i32
    return %arg0, %c0_i32 : i32, i32
  }
  func.func @transform_1(%arg0: i32) -> (i32, i32, i32) {
    %c0_i32 = arith.constant 0 : i32
    %c0_i32_0 = arith.constant 0 : i32
    %c0_i32_1 = arith.constant 0 : i32
    %c0_i32_2 = arith.constant 0 : i32
    return %c0_i32, %c0_i32_0, %c0_i32_1 : i32, i32, i32
  }
  func.func @transform_2(%arg0: i32) -> (i32, i32) {
    %c0_i32 = arith.constant 0 : i32
    %c0_i32_0 = arith.constant 0 : i32
    %c0_i32_1 = arith.constant 0 : i32
    return %c0_i32, %c0_i32_0 : i32, i32
  }
  func.func @transform_3(%arg0: i32) -> (i32, i32) {
    %c0_i32 = arith.constant 0 : i32
    %c0_i32_0 = arith.constant 0 : i32
    %c0_i32_1 = arith.constant 0 : i32
    return %c0_i32, %c0_i32_0 : i32, i32
  }
  func.func @transform_4(%arg0: i32) -> (i32, i32, i32) {
    %c0_i32 = arith.constant 0 : i32
    %c0_i32_0 = arith.constant 0 : i32
    %c0_i32_1 = arith.constant 0 : i32
    return %arg0, %c0_i32, %c0_i32_0 : i32, i32, i32
  }
}

</mosaic_0001>

<bundles_post_ra>
// kernel: tpu_custom_call.1
= control target key start
LH: loop header
LB: loop body
LE: loop exit
PB: predicated region body
PF: predicated region fallthrough
CT: control target
= control target key end

     0   :  { %9 = vsyncpa [#allocation3], 0  ;;  %s438_s0 = inlined_call_operand.hbm [shape: f32[32,32], index: 0, kind: input, shape index: {}]   ;;  %s439_s1 = inlined_call_operand.hbm [shape: f32[2,32,32], index: 1, kind: input, shape index: {}]   ;;  %s440_s2 = inlined_call_operand.hbm [shape: f32[16,32], index: 2, kind: input, shape index: {}]   ;;  %s441_s3 = inlined_call_operand.vmem [shape: f32[1,64], index: 3, kind: input, shape index: {}]   ;;  %s442_s4 = inlined_call_operand.hbm [shape: f32[1,16,64], index: 4, kind: output, shape index: {}]  }
   0x1   :  { %10 = vsyncpa [#allocation6], 0 }
   0x2   :  { %11 = vsyncpa [#allocation4], 0  ;;  %s29_s17 = sshll.u32 %s439_s1, 4  ;;  %s365_s18 = smov [#allocation5]   ;;  %s30_s17 = int_to_ptr.hbm [resolvable:$true] %s29_s17 }
   0x3   :  { %s31_s19 = sshll.u32 %s365_s18, 4  ;;  %s16_s22 = sshll.u32 %s438_s0, 4  ;;  %s32_s19 = int_to_ptr.vmem [resolvable:$true] %s31_s19  ;;  %s17_s22 = int_to_ptr.hbm [resolvable:$true] %s16_s22 }
   0x4   :  { %s366_s23 = smov 128   ;;  %s367_s24 = smov 8  }
   0x5   :  { %37 = dma.hbm_to_vmem [thread:$0]  %s30_s17, 1024, %s32_s19, [#allocation6], %s366_s23, %s366_s23, %s367_s24  }
   0x6   :  { %s368_s25 = smov [#allocation2]   ;;  %s42_s1 = sshll.u32 %s440_s2, 4  ;;  %s43_s1 = int_to_ptr.hbm [resolvable:$true] %s42_s1 }
   0x7   :  { %s18_s26 = sshll.u32 %s368_s25, 4  ;;  %s369_s0 = smov [#allocation7]   ;;  %s19_s26 = int_to_ptr.vmem [resolvable:$true] %s18_s26 }
   0x8   :  { %24 = dma.hbm_to_vmem [thread:$0]  %s17_s22, 512, %s19_s26, [#allocation3], %s366_s23, %s366_s23, %s367_s24  }
   0x9   :  { %s44_s29 = sshll.u32 %s369_s0, 4  ;;  %s45_s29 = int_to_ptr.vmem [resolvable:$true] %s44_s29 }
   0xa   :  { %50 = dma.hbm_to_vmem [thread:$0]  %s43_s1, 256, %s45_s29, [#allocation6], %s366_s23, %s366_s23, %s367_s24  }
   0xb   :  { %359 = dma.done.wait [#allocation3], 512  }
   0xc   :  { %360 = vsyncadd [#allocation3], 4294966784 }
   0xd   :  { %361 = dma.done.wait [#allocation6], 1280  }
   0xe   :  { %362 = vsyncadd [#allocation6], 4294966016  ;;  %v72_v0 = vld [vmem:[#allocation5 + $0x18] sm:$0xff]  ;;  %v71_v2 = vld [vmem:[#allocation5 + $0x10] sm:$0xff]  ;;  %vm73_vm0 = vcmask 261120   ;;  %s370_s2 = smov 32  }
   0xf   :  { %v129_v1 = vld [vmem:[#allocation5 + $0x38] sm:$0xff]  ;;  %237 = vmatpush.msra.mxu3 %v72_v0  ;;  %v128_v3 = vld [vmem:[#allocation5 + $0x30] sm:$0xff]  ;;  %v70_v4 = vld [vmem:[#allocation5 + $0x8] sm:$0xff]  ;;  %98 = vmatpush.msra.mxu0 %v72_v0  ;;  %vm204_vm1 = vcmask 523264   ;;  %s371_s6 = smov [#allocation8]   ;;  %s213_s10 = sshll.u32 %s442_s4, 4  ;;  %s214_s10 = int_to_ptr.hbm [resolvable:$true] %s213_s10 }
  0x10   :  { %241 = vmatpush.msra.mxu1 %v129_v1  ;;  %v127_v5 = vld [vmem:[#allocation5 + $0x28] sm:$0xff]  ;;  %v69_v6 = vld [vmem:[#allocation5] sm:$0xff]  ;;  %v67_v9 = vld [vmem:[#allocation2 + $0x10] sm:$0xff]  ;;  %s211_s7 = sshll.u32 %s371_s6, 4  ;;  %s212_s7 = int_to_ptr.vmem [resolvable:$true] %s211_s7 }
  0x11   :  { %238 = vmatpush.msra.mxu3 %v71_v2  ;;  %v126_v7 = vld [vmem:[#allocation5 + $0x20] sm:$0xff]  ;;  %99 = vmatpush.msra.mxu0 %v71_v2  ;;  %v66_v8 = vld [vmem:[#allocation2 + $0x8] sm:$0xff]  ;;  %v68_v10 = vld [vmem:[#allocation2 + $0x18] sm:$0xff] }
  0x12   :  { %242 = vmatpush.msra.mxu1 %v128_v3  ;;  %v65_v11 = vld [vmem:[#allocation2] sm:$0xff]  ;;  %v170_v33 = vld [vmem:[#allocation7 + $0x8] sm:$0xff] }
  0x13   :  { %239 = vmatpush.msra.mxu3 %v70_v4  ;;  %100 = vmatpush.msra.mxu0 %v70_v4  ;;  %v169_v31 = vld [vmem:[#allocation7] sm:$0xff] }
  0x14   :  { %243 = vmatpush.msra.mxu1 %v127_v5  ;;  %v262_v34 = vld [vmem:[%s441_s3] ss:$0 sm:$0xff] }
  0x15   :  { %240 = vmatpush.msra.mxu3 %v69_v6  ;;  %101 = vmatpush.msra.mxu0 %v69_v6 }
  0x16   :  { %244 = vmatpush.msra.mxu1 %v126_v7  ;;  %228 = vmatmul.msk.f32.vlgmr.msra.gmra.mxu3 %vm73_vm0, %v66_v8 }
  0x17   :  { %232 = vmatmul.msk.f32.vlgmr.msra.gmra.mxu1 %vm73_vm0, %v66_v8  ;;  %142 = vmatpush.msrb.mxu0 %v129_v1 }
  0x18   :  { %227 = vmatmul.msk.f32.vlgmr.msra.gmra.mxu0 %vm73_vm0, %v65_v11 }
  0x19   :  { %143 = vmatpush.msrb.mxu0 %v128_v3 }
  0x1b   :  { %144 = vmatpush.msrb.mxu0 %v127_v5 }
  0x1d   :  { %145 = vmatpush.msrb.mxu0 %v126_v7 }
  0x1e   :  { %229 = vmatmul.msk.f32.gmra.mxu3 %vm73_vm0, %v67_v9 }
  0x1f   :  { %233 = vmatmul.msk.f32.gmra.mxu1 %vm73_vm0, %v67_v9 }
  0x20   :  { %231 = vmatmul.msk.f32.vlgmr.msrb.gmra.mxu0 %vm73_vm0, %v65_v11 }
  0x26   :  { %230 = vmatmul.msk.f32.gmra.mxu3 %vm73_vm0, %v68_v10 }
  0x27   :  { %234 = vmatmul.msk.f32.gmra.mxu1 %vm73_vm0, %v68_v10 }
  0x94   :  { %v150_v12 = vpop.f32.mrf.mxu1 }
  0x95   :  { %v103_v20 = vpop.f32.mrf.mxu0 }
  0x99   :  { %v106_v13 = vpop.f32.mrf.mxu3 }
  0x9c   :  { %v153_v14 = vpop.f32.mrf.mxu1 }
  0x9d   :  { %v147_v24 = vpop.f32.mrf.mxu0 }
  0xa1   :  { %v109_v15 = vpop.f32.mrf.mxu3 }
  0xa4   :  { %v156_v16 = vpop.f32.mrf.mxu1 }
  0xa5   :  { %v252_v17 = vpack.i.bf16 %v153_v14, %v156_v16 }
  0xa7   :  { %253 = vrot.lane.b32.xlu0 %v252_v17, %s370_s2 }
  0xa9   :  { %v112_v18 = vpop.f32.mrf.mxu3 }
  0xaa   :  { %v257_v19 = vpack.i.bf16 %v109_v15, %v112_v18 }
  0xaf   :  { %258 = vrot.lane.b32.xlu0 %v257_v19, %s370_s2 }
 0x119   :  { %v254_v21 = vpop.permute.xlu0 %253 }
 0x11a   :  { %v256_v22 = vunpack.i.h.bf16 %v254_v21  ;;  %v255_v23 = vunpack.i.l.bf16 %v254_v21 }
 0x11c   :  { %v168_v25 = vsel %vm73_vm0, %v150_v12, %v255_v23  ;;  %v167_v26 = vsel %vm73_vm0, %v147_v24, %v256_v22 }
 0x11d   :  { %193 = vmatpush.msra.mxu2 %v168_v25 }
 0x11f   :  { %194 = vmatpush.msra.mxu2 %v167_v26 }
 0x121   :  { %v259_v27 = vpop.permute.xlu0 %258 }
 0x122   :  { %v261_v28 = vunpack.i.h.bf16 %v259_v27  ;;  %v260_v29 = vunpack.i.l.bf16 %v259_v27 }
 0x124   :  { %v124_v30 = vsel %vm73_vm0, %v106_v13, %v260_v29  ;;  %v123_v32 = vsel %vm73_vm0, %v103_v20, %v261_v28 }
 0x125   :  { %195 = vmatpush.msra.mxu2 %v124_v30 }
 0x127   :  { %196 = vmatpush.msra.mxu2 %v123_v32 }
 0x128   :  { %235 = vmatmul.msk.f32.vlgmr.msra.gmra.mxu2 %vm73_vm0, %v169_v31 }
 0x130   :  { %236 = vmatmul.msk.f32.gmra.mxu2 %vm73_vm0, %v170_v33 }
 0x1ab   :  { %v198_v35 = vpop.f32.mrf.mxu2 }
 0x1ac   :  { %v199_v36 = vadd.f32 %v262_v34, %v198_v35 }
 0x1ae   :  { %205 = vst.msk [vmem:[#allocation8] sm:$0xff] %vm204_vm1, %v199_v36 }
 0x1b3   :  { %v201_v37 = vpop.f32.mrf.mxu2 }
 0x1b4   :  { %v202_v38 = vadd.f32 %v262_v34, %v201_v37 }
 0x1b6   :  { %206 = vst.msk [vmem:[#allocation8 + $0x8] sm:$0xff] %vm204_vm1, %v202_v38 }
 0x1b7   :  { %219 = dma.vmem_to_hbm [thread:$0]  %s212_s7, 256, %s214_s10, [#allocation4], %s366_s23, %s366_s23, %s367_s24  }
 0x1b8   :  { %363 = dma.done.wait [#allocation4], 256  }
 0x1b9   :  { %364 = vsyncadd [#allocation4], 4294967040 }
 0x1ba   :  { %224 = vsyncpa [#allocation3], 1 }
 0x1bb   :  { %225 = vsyncpa [#allocation6], 1 }
 0x1bc   :  { %226 = vsyncpa [#allocation4], 1 }

</bundles_post_ra>
